<compile_context>
chip_gen: v7x
topology: tpu7x:2x2x1
jax: 0.10.0
libtpu: 0.0.40
codegen_flags: <defaults>
</compile_context>

<pallas_src>
import numpy as np
import jax
import jax.numpy as jnp
from jax.experimental import pallas as pl
from jax.experimental.pallas import tpu as pltpu


def _round_up(x, m):
    return ((x + m - 1) // m) * m


# --------------------------------------------------------------------------------
# One-time hardware probes (cached at module level).
# --------------------------------------------------------------------------------

_ROLL_MODE = "unprobed"          # "jnp" | "neg" | None (roll unusable)


def _roll_mode():
    """Probe pltpu.roll's shift-sign convention on the real backend.

    Returns "jnp" if pltpu.roll(x, s) == jnp.roll(x, s), "neg" if it is the
    opposite convention, or None if roll cannot be used (fallback to slices).
    """
    global _ROLL_MODE
    if _ROLL_MODE != "unprobed":
        return _ROLL_MODE
    try:
        def probe(x_ref, o_ref):
            o_ref[...] = pltpu.roll(x_ref[...], shift=1, axis=1)

        x = jnp.broadcast_to(jnp.arange(128, dtype=jnp.float32)[None, :], (8, 128))
        out = pl.pallas_call(
            probe, out_shape=jax.ShapeDtypeStruct((8, 128), jnp.float32)
        )(x)
        out = np.asarray(jax.block_until_ready(out))
        if np.isclose(out[0, 1], 0.0):       # jnp.roll(row, +1)[1] == row[0] == 0
            _ROLL_MODE = "jnp"
        elif np.isclose(out[0, 1], 2.0):     # opposite convention: row[2] == 2
            _ROLL_MODE = "neg"
        else:
            _ROLL_MODE = None
    except Exception:
        _ROLL_MODE = None
    return _ROLL_MODE


def _pick_tiling():
    """(batch_tile, vmem_limit_bytes) per TPU generation; conservative default."""
    try:
        info = pltpu.get_tpu_info()
        vmem_cap = getattr(info, "vmem_capacity_bytes", None)
    except Exception:
        vmem_cap = None
    if vmem_cap is not None and vmem_cap >= 96 * 1024 * 1024:
        return 512, 64 * 1024 * 1024         # v5e / v6e: 128 MiB physical VMEM
    return 256, 32 * 1024 * 1024             # v7x (64 MiB VMEM) or unknown


# --------------------------------------------------------------------------------
# Kernel
# --------------------------------------------------------------------------------

def make_contextual_sampling_kernel(k, nums, n_groups, G, Gext, roll_mode):
    """Closure over static conv geometry.

    Refs (in order):
      w1_ref : SMEM (k,)              f32   conv1 tap weights
      b1_ref : SMEM (1,)              f32   conv1 bias
      b2_ref : SMEM (1,)              f32   conv2 bias
      s_ref  : VMEM (n_groups*G, 128) bf16  stacked per-group conv2 blocks (resident)
      xz_ref : VMEM (TB, Lxz)         bf16  padded input tile, time on lanes
      out_ref: VMEM (TB, N_OUT)       bf16  lane-dense output tile
    """

    def taps(win_f32):
        # Yields the k shifted views win[:, off:off+G] with off = j*nums.
        for j in range(k):
            off = j * nums
            if off == 0:
                yield win_f32[:, :G]
            elif roll_mode == "jnp":
                yield pltpu.roll(win_f32, shift=(Gext - off) % Gext, axis=1)[:, :G]
            elif roll_mode == "neg":
                yield pltpu.roll(win_f32, shift=off, axis=1)[:, :G]
            else:
                # Fallback: unaligned lane slice (correct; costs a relayout copy).
                yield win_f32[:, off:off + G]

    def kernel(w1_ref, b1_ref, b2_ref, s_ref, xz_ref, out_ref):
        b1 = b1_ref[0]
        b2 = b2_ref[0]
        # Static unroll over 128-lane output groups (n_groups is small: N_OUT/128).
        for g in range(n_groups):
            # Lane-aligned window covering this group's conv1 receptive field.
            win = xz_ref[:, g * G: g * G + Gext].astype(jnp.float32)

            # ---- conv1 (dilated, kernel=k): k shift-and-accumulate VPU FMAs ----
            acc = None
            for j, tap in enumerate(taps(win)):
                term = w1_ref[j] * tap
                acc = term if acc is None else acc + term
            h = jnp.tanh(acc + b1).astype(jnp.bfloat16)       # (TB, G)

            # ---- conv2 (kernel=nums, stride=nums): one bf16 MXU matmul ----
            blk = jnp.dot(h, s_ref[g * G:(g + 1) * G, :],
                          preferred_element_type=jnp.float32)  # (TB, 128)
            out_ref[:, g * 128:(g + 1) * 128] = (
                jnp.tanh(blk + b2).astype(out_ref.dtype))

    return kernel


# --------------------------------------------------------------------------------
# Module wrapper
# --------------------------------------------------------------------------------

class ContextualSamplingPallas:
    def __init__(self, seq_len, pred_len, length, k, key,
                 batch_tile=None, vmem_limit_bytes=None):
        self.seq_len, self.pred_len, self.length, self.k = seq_len, pred_len, length, k
        total = seq_len + pred_len
        if total % length != 0:
            self.nums = total // length + 1
            self.padding = self.nums * length - total
        else:
            self.nums = total // length
            self.padding = 0
        self.conv1_pad = self.nums * (k - 1) // 2
        self.L_pad = total + self.padding                     # = nums * length
        self.Lz = self.L_pad + 2 * self.conv1_pad             # conv1-padded input len
        self.L1 = self.Lz - self.nums * (k - 1)               # conv1 output length
        self.L2 = (self.L1 - self.nums) // self.nums + 1      # conv2 output length
        self.N_OUT = _round_up(self.L2, 128)                  # lane-dense output width
        self.G = 128 * self.nums                               # conv1 rows per group
        self.n_groups = self.N_OUT // 128
        self.L1r = self.n_groups * self.G                      # group-padded conv1 len
        # lane-padded kernel-input length: every per-group window stays in bounds
        self.Lxz = _round_up(max(self.Lz, self.L1r + self.nums * (k - 1)), 128)
        self.Gext = self.G + (self.Lxz - self.L1r)             # per-group window width

        auto_bt, auto_vmem = _pick_tiling()
        self.batch_tile = batch_tile if batch_tile is not None else auto_bt
        self.vmem_limit = (vmem_limit_bytes if vmem_limit_bytes is not None
                           else auto_vmem)

        # Deterministic "init" of parameters (shapes from nn.Conv1d(1,1,...)).
        k1, k2, k3, k4 = jax.random.split(key, 4)
        self.w1 = jax.random.normal(k1, (k,), jnp.float32) * 0.5
        self.b1 = jax.random.normal(k2, (1,), jnp.float32) * 0.1
        self.w2 = jax.random.normal(k3, (self.nums,), jnp.float32) * 0.5
        self.b2 = jax.random.normal(k4, (1,), jnp.float32) * 0.1

        # Blocked conv2 selection matrix (banded structure): output lane-group g only
        # reads conv1 rows [g*G, (g+1)*G).  Stack per-group (G,128) blocks into one
        # (n_groups*G, 128) bf16 matrix (resident in VMEM); ~N_OUT/128x smaller than
        # the dense (L1, N_OUT) selection matrix.
        #   S_g[r, c] = w2[r - c*nums]  if 0 <= r - c*nums < nums and g*128 + c < L2
        r = jnp.arange(self.G)[:, None]
        c = jnp.arange(128)[None, :]
        d = r - c * self.nums
        band = (d >= 0) & (d < self.nums)
        gathered = self.w2[jnp.clip(d, 0, self.nums - 1)]
        blocks = [jnp.where(band & ((c + g * 128) < self.L2), gathered, 0.0)
                  for g in range(self.n_groups)]
        self.S = jnp.concatenate(blocks, axis=0).astype(jnp.bfloat16)

    def __call__(self, x_enc, x):
        # x_enc: (B, 1, seq_len), x: (B, 1, pred_len)  [NCL like PyTorch]
        B = x_enc.shape[0]
        P, pad, total = self.conv1_pad, self.padding, self.seq_len + self.pred_len

        xe = x_enc[:, 0, :].astype(jnp.float32)
        xd = x[:, 0, :].astype(jnp.float32)
        last = (xd if self.pred_len > 0 else xe)[:, -1:]       # replication source
        pieces = []
        if P > 0:
            pieces.append(jnp.zeros((B, P), jnp.float32))       # conv1 left zero-pad
        pieces += [xe, xd]                                       # cat([x_enc, x])
        if pad > 0:
            pieces.append(jnp.broadcast_to(last, (B, pad)))      # ReplicationPad1d
        tail = self.Lxz - (P + total + pad)                      # conv1 right zero-pad
        if tail > 0:                                             # + lane alignment
            pieces.append(jnp.zeros((B, tail), jnp.float32))
        # Single fused concat -> one HBM materialization; bf16 halves DMA bytes.
        xz = jnp.concatenate(pieces, axis=-1).astype(jnp.bfloat16)   # (B, Lxz)

        # Batch tile: multiple of 8 sublanes; guarantee >= 2 batch grid steps when
        # possible so both TensorCores are used on v7x (megacore, "parallel" axis).
        TB = min(self.batch_tile, _round_up(B, 8))
        if B >= 16 and _round_up(B, TB) // TB < 2:
            TB = _round_up((B + 1) // 2, 8)
        TB = max(8, _round_up(TB, 8))
        B_pad = _round_up(B, TB)
        if B_pad != B:
            xz = jnp.pad(xz, ((0, B_pad - B), (0, 0)))

        kernel = make_contextual_sampling_kernel(
            self.k, self.nums, self.n_groups, self.G, self.Gext, _roll_mode())

        out = pl.pallas_call(
            kernel,
            out_shape=jax.ShapeDtypeStruct((B_pad, self.N_OUT), jnp.bfloat16),
            grid=(B_pad // TB,),
            in_specs=[
                pl.BlockSpec(memory_space=pltpu.MemorySpace.SMEM),             # w1
                pl.BlockSpec(memory_space=pltpu.MemorySpace.SMEM),             # b1
                pl.BlockSpec(memory_space=pltpu.MemorySpace.SMEM),             # b2
                pl.BlockSpec((self.n_groups * self.G, 128), lambda i: (0, 0)),  # S
                pl.BlockSpec((TB, self.Lxz), lambda i: (i, 0)),                 # xz
            ],
            out_specs=pl.BlockSpec((TB, self.N_OUT), lambda i: (i, 0)),
            compiler_params=pltpu.CompilerParams(
                dimension_semantics=("parallel",),
                vmem_limit_bytes=self.vmem_limit,
            ),
        )(self.w1, self.b1, self.b2, self.S, xz)

        # Padded columns [L2, N_OUT) hold tanh(b2) (zero S columns) -> slice them off;
        # upcast the bf16 HBM tile back to f32 for API parity with the PyTorch module.
        return out[:B, :self.L2].astype(jnp.float32)[:, None, :]     # (B, 1, length)


# ----------------------------- references ---------------------------------------

def _bf16(x):
    """Round-trip through bfloat16 (matches the kernel's quantization points)."""
    return np.asarray(jnp.asarray(np.asarray(x), jnp.bfloat16).astype(jnp.float32))


def _numpy_reference(x_enc, x, w1, b1, w2, b2, nums, k, padding, conv1_pad,
                     bf16_casts=False):
    xx = np.concatenate([x_enc, x], axis=-1).astype(np.float32)   # (B,1,total)
    if padding > 0:
        rep = np.repeat(xx[..., -1:], padding, axis=-1)
        xx = np.concatenate([xx, rep], axis=-1)
    P = conv1_pad
    xz = np.pad(xx, ((0, 0), (0, 0), (P, P)))
    if bf16_casts:
        xz = _bf16(xz)
        w2 = _bf16(w2)
    L1 = xz.shape[-1] - nums * (k - 1)
    out1 = np.zeros(xx.shape[:2] + (L1,), np.float32)
    for j in range(k):
        out1 += w1[j] * xz[..., j * nums: j * nums + L1]
    out1 = np.tanh(out1 + b1[0])
    if bf16_casts:
        out1 = _bf16(out1)
    L2 = (L1 - nums) // nums + 1
    out2 = np.zeros(xx.shape[:2] + (L2,), np.float32)
    for j in range(nums):
        out2 += w2[j] * out1[..., j: j + (L2 - 1) * nums + 1: nums]
    return np.tanh(out2 + b2[0])


if __name__ == "__main__":
    # Small, forward-consistent shapes: seq_len=8, pred_len=6, length=4, k=3
    # -> total=14, nums=4, padding=2, conv1 dilation=4, conv1 pad=4, output (B,1,4).
    B, seq_len, pred_len, length, k = 2, 8, 6, 4, 3

    key = jax.random.PRNGKey(0)
    k_in1, k_in2, k_par = jax.random.split(key, 3)
    x_enc = jax.random.normal(k_in1, (B, 1, seq_len), jnp.float32)
    x_dec = jax.random.normal(k_in2, (B, 1, pred_len), jnp.float32)

    module = ContextualSamplingPallas(seq_len, pred_len, length, k, k_par)

    out = jax.block_until_ready(module(x_enc, x_dec))
    out_np = np.asarray(out)

    args = (np.asarray(x_enc), np.asarray(x_dec),
            np.asarray(module.w1), np.asarray(module.b1),
            np.asarray(module.w2), np.asarray(module.b2),
            module.nums, module.k, module.padding, module.conv1_pad)
    ref_bf16 = _numpy_reference(*args, bf16_casts=True)   # emulates kernel bf16 casts
    ref_f32 = _numpy_reference(*args, bf16_casts=False)   # pure f32 PyTorch semantics

    assert out.shape == (B, 1, length), out.shape
    # Tight check against a reference that mirrors the kernel's bf16 quantization.
    assert np.allclose(out_np, ref_bf16, atol=2e-2, rtol=2e-2), \
        np.max(np.abs(out_np - ref_bf16))
    # Loose check against the full-precision reference (bf16 input/MXU operands).
    assert np.allclose(out_np, ref_f32, atol=1e-1, rtol=1e-1), \
        np.max(np.abs(out_np - ref_f32))
    print("KERNEL_OK")
</pallas_src>

<mosaic_0001>
module attributes {stable_mosaic.version = 11 : i64} {
  func.func @probe(%arg0: memref<8x128xf32, #tpu.memory_space<vmem>>, %arg1: memref<8x128xf32, #tpu.memory_space<vmem>>) attributes {dimension_semantics = [], scalar_prefetch = 0 : i64, scratch_operands = 0 : i64, tpu.core_type = #tpu.core_type<tc>} {
    %c0 = arith.constant 0 : index
    %c0_0 = arith.constant 0 : index
    %0 = vector.load %arg0[%c0, %c0_0] : memref<8x128xf32, #tpu.memory_space<vmem>>, vector<8x128xf32>
    %c1_i32 = arith.constant 1 : i32
    %1 = tpu.dynamic_rotate %0 by %c1_i32 dim 1 : vector<8x128xf32>, i32 -> vector<8x128xf32>
    %c0_1 = arith.constant 0 : index
    %c0_2 = arith.constant 0 : index
    %2 = vector.load %arg1[%c0_1, %c0_2] : memref<8x128xf32, #tpu.memory_space<vmem>>, vector<8x128xf32>
    tpu.vector_store %arg1[%c0_1, %c0_2], %1 {strides = array<i32>} : memref<8x128xf32, #tpu.memory_space<vmem>>, vector<8x128xf32>,
    return
  }
}

module attributes {stable_mosaic.version = 11 : i64} {
  func.func @kernel(%arg0: i32, %arg1: memref<3xf32, #tpu.memory_space<smem>>, %arg2: memref<1xf32, #tpu.memory_space<smem>>, %arg3: memref<1xf32, #tpu.memory_space<smem>>, %arg4: memref<512x128xbf16, #tpu.memory_space<vmem>>, %arg5: memref<8x640xbf16, #tpu.memory_space<vmem>>, %arg6: memref<8x128xbf16, #tpu.memory_space<vmem>>) attributes {dimension_semantics = [#tpu.dimension_semantics<parallel>], iteration_bounds = array<i64: 1>, scalar_prefetch = 0 : i64, scratch_operands = 0 : i64, tpu.core_type = #tpu.core_type<tc>, window_params = [{transform_indices = @transform_0, window_bounds = array<i64: 3>}, {transform_indices = @transform_1, window_bounds = array<i64: 1>}, {transform_indices = @transform_2, window_bounds = array<i64: 1>}, {pipeline_mode = #tpu.pipeline_mode<synchronous>, transform_indices = @transform_3, window_bounds = array<i64: 512, 128>}, {transform_indices = @transform_4, window_bounds = array<i64: 8, 640>}, {transform_indices = @transform_5, window_bounds = array<i64: 8, 128>}]} {
    %c0 = arith.constant 0 : index
    %0 = memref.load %arg2[%c0] : memref<1xf32, #tpu.memory_space<smem>>
    %c0_0 = arith.constant 0 : index
    %1 = memref.load %arg3[%c0_0] : memref<1xf32, #tpu.memory_space<smem>>
    %c0_1 = arith.constant 0 : index
    %c0_2 = arith.constant 0 : index
    %2 = vector.load %arg5[%c0_1, %c0_2] : memref<8x640xbf16, #tpu.memory_space<vmem>>, vector<8x640xbf16>
    %3 = arith.extf %2 : vector<8x640xbf16> to vector<8x640xf32>
    %4 = vector.extract_strided_slice %3 {offsets = [0, 0], sizes = [8, 512], strides = [1, 1]} : vector<8x640xf32> to vector<8x512xf32>
    %c0_3 = arith.constant 0 : index
    %5 = memref.load %arg1[%c0_3] : memref<3xf32, #tpu.memory_space<smem>>
    %6 = vector.broadcast %5 : f32 to vector<8x512xf32>
    %7 = arith.mulf %6, %4 : vector<8x512xf32>
    %8 = vector.extract_strided_slice %3 {offsets = [0, 4], sizes = [8, 512], strides = [1, 1]} : vector<8x640xf32> to vector<8x512xf32>
    %c1 = arith.constant 1 : index
    %9 = memref.load %arg1[%c1] : memref<3xf32, #tpu.memory_space<smem>>
    %10 = vector.broadcast %9 : f32 to vector<8x512xf32>
    %11 = arith.mulf %10, %8 : vector<8x512xf32>
    %12 = arith.addf %7, %11 : vector<8x512xf32>
    %13 = vector.extract_strided_slice %3 {offsets = [0, 8], sizes = [8, 512], strides = [1, 1]} : vector<8x640xf32> to vector<8x512xf32>
    %c2 = arith.constant 2 : index
    %14 = memref.load %arg1[%c2] : memref<3xf32, #tpu.memory_space<smem>>
    %15 = vector.broadcast %14 : f32 to vector<8x512xf32>
    %16 = arith.mulf %15, %13 : vector<8x512xf32>
    %17 = arith.addf %12, %16 : vector<8x512xf32>
    %18 = vector.broadcast %0 : f32 to vector<8x512xf32>
    %19 = arith.addf %17, %18 : vector<8x512xf32>
    %20 = math.tanh %19 : vector<8x512xf32>
    %21 = arith.truncf %20 : vector<8x512xf32> to vector<8x512xbf16>
    %c0_4 = arith.constant 0 : index
    %c0_5 = arith.constant 0 : index
    %22 = vector.load %arg4[%c0_4, %c0_5] : memref<512x128xbf16, #tpu.memory_space<vmem>>, vector<512x128xbf16>
    %cst = arith.constant dense<0.000000e+00> : vector<8x128xf32>
    %23 = tpu.matmul %21, %22, %cst {dimension_numbers = #tpu.dot_dimension_numbers<[1], [0], [0], [1], [0, 0, 1, 1], [], []>} : vector<8x512xbf16>, vector<512x128xbf16>, vector<8x128xf32> -> vector<8x128xf32>
    %24 = vector.broadcast %1 : f32 to vector<8x128xf32>
    %25 = arith.addf %23, %24 : vector<8x128xf32>
    %26 = math.tanh %25 : vector<8x128xf32>
    %27 = arith.truncf %26 : vector<8x128xf32> to vector<8x128xbf16>
    %c0_6 = arith.constant 0 : index
    %c0_7 = arith.constant 0 : index
    %28 = vector.load %arg6[%c0_6, %c0_7] : memref<8x128xbf16, #tpu.memory_space<vmem>>, vector<8x128xbf16>
    tpu.vector_store %arg6[%c0_6, %c0_7], %27 {strides = array<i32>} : memref<8x128xbf16, #tpu.memory_space<vmem>>, vector<8x128xbf16>,
    return
  }
  func.func @transform_0(%arg0: i32) -> i32 {
    %c0_i32 = arith.constant 0 : i32
    %c0_i32_0 = arith.constant 0 : i32
    return %c0_i32 : i32
  }
  func.func @transform_1(%arg0: i32) -> i32 {
    %c0_i32 = arith.constant 0 : i32
    %c0_i32_0 = arith.constant 0 : i32
    return %c0_i32 : i32
  }
  func.func @transform_2(%arg0: i32) -> i32 {
    %c0_i32 = arith.constant 0 : i32
    %c0_i32_0 = arith.constant 0 : i32
    return %c0_i32 : i32
  }
  func.func @transform_3(%arg0: i32) -> (i32, i32) {
    %c0_i32 = arith.constant 0 : i32
    %c0_i32_0 = arith.constant 0 : i32
    %c0_i32_1 = arith.constant 0 : i32
    return %c0_i32, %c0_i32_0 : i32, i32
  }
  func.func @transform_4(%arg0: i32) -> (i32, i32) {
    %c0_i32 = arith.constant 0 : i32
    %c0_i32_0 = arith.constant 0 : i32
    return %arg0, %c0_i32 : i32, i32
  }
  func.func @transform_5(%arg0: i32) -> (i32, i32) {
    %c0_i32 = arith.constant 0 : i32
    %c0_i32_0 = arith.constant 0 : i32
    return %arg0, %c0_i32 : i32, i32
  }
}

</mosaic_0001>

<bundles_post_ra>
// kernel: tpu_custom_call.1
= control target key start
LH: loop header
LB: loop body
LE: loop exit
PB: predicated region body
PF: predicated region fallthrough
CT: control target
= control target key end

     0   :  { %6 = vsyncpa [#allocation3], 0  ;;  %s128_s0 = inlined_call_operand.hbm [shape: f32[8,128], index: 0, kind: input, shape index: {}]   ;;  %s129_s1 = inlined_call_operand.hbm [shape: f32[8,128], index: 1, kind: output, shape index: {}]  }
   0x1   :  { %7 = vsyncpa [#allocation4], 0  ;;  %s91_s6 = smov [#allocation2]   ;;  %s43_s10 = scalar_lea.hbm %s128_s0, 128 }
   0x2   :  { %s14_s7 = sshll.u32 %s91_s6, 4  ;;  %p44_p0 = scmp.ne.s32.totalorder %s128_s0, %s43_s10  ;;  %s15_s7 = int_to_ptr.vmem [resolvable:$true] %s14_s7 }
   0x3   :  { %p47_p1 = scmp.lt.u32.totalorder %s43_s10, %s128_s0 }
   0x5   :  { %p49_p2 = pnand %p47_p1, %p44_p0 }
   0x7   :  { %52 = shalt.err (!%p49_p2)
}
   0x8   :  { %s53_s15 = scalar_lea.vmem %s15_s7, 128  ;;  %p58_p4 = scmp.lt.s32.totalorder %s15_s7, %s15_s7 }
   0x9   :  { %p54_p3 = scmp.ne.s32.totalorder %s15_s7, %s53_s15  ;;  %p59_p5 = scmp.lt.s32.totalorder %s53_s15, %s53_s15 }
   0xb   :  { %p60_p6 = por %p59_p5, %p58_p4 }
   0xd   :  { %p61_p7 = pnand %p60_p6, %p54_p3 }
   0xf   :  { %64 = shalt.err (!%p61_p7)
}
  0x10   :  { %17 = dma.hbm_to_vmem [thread:$0]  %s128_s0, 128, %s15_s7, [#allocation3]  }
  0x11   :  { %87 = dma.done.wait [#allocation3], 128  }
  0x12   :  { %88 = vsyncadd [#allocation3], 4294967168  ;;  %v21_v0 = vld [vmem:[#allocation2] sm:$0xff]  ;;  %s92_s18 = smov 1   ;;  %s93_s19 = smov [#allocation5]  }
  0x13   :  { %22 = vrot.lane.b32.xlu0 %v21_v0, %s92_s18  ;;  %s31_s20 = sshll.u32 %s93_s19, 4  ;;  %s32_s20 = int_to_ptr.vmem [resolvable:$true] %s31_s20 }
  0x14   :  { %s65_s21 = scalar_lea.vmem %s32_s20, 128  ;;  %p70_p9 = scmp.lt.s32.totalorder %s32_s20, %s32_s20 }
  0x15   :  { %p66_p8 = scmp.ne.s32.totalorder %s32_s20, %s65_s21  ;;  %p71_p10 = scmp.lt.s32.totalorder %s65_s21, %s65_s21 }
  0x17   :  { %p72_p11 = por %p71_p10, %p70_p9 }
  0x19   :  { %p73_p12 = pnand %p72_p11, %p66_p8 }
  0x85   :  { %v23_v1 = vpop.permute.xlu0 %22 }
  0x86   :  { %24 = vst [vmem:[#allocation5] sm:$0xff] %v23_v1 }
  0x87   :  { %76 = shalt.err (!%p73_p12)
}
  0x88   :  { %s77_s0 = scalar_lea.hbm %s129_s1, 128 }
  0x89   :  { %p78_p13 = scmp.ne.s32.totalorder %s129_s1, %s77_s0  ;;  %p81_p0 = scmp.lt.u32.totalorder %s77_s0, %s129_s1 }
  0x8b   :  { %p83_p1 = pnand %p81_p0, %p78_p13 }
  0x8d   :  { %86 = shalt.err (!%p83_p1)
}
  0x8e   :  { %34 = dma.vmem_to_hbm [thread:$0]  %s32_s20, 128, %s129_s1, [#allocation4]  }
  0x8f   :  { %89 = dma.done.wait [#allocation4], 128  }
  0x90   :  { %90 = vsyncadd [#allocation4], 4294967168 }
  0x91   :  { %38 = vsyncpa [#allocation3], 1 }
  0x92   :  { %39 = vsyncpa [#allocation4], 1 }

// kernel: tpu_custom_call.1
= control target key start
LH: loop header
LB: loop body
LE: loop exit
PB: predicated region body
PF: predicated region fallthrough
CT: control target
= control target key end

     0   :  { %12 = vsyncpa [#allocation7], 0  ;;  %s844_s0 = inlined_call_operand.vmem [shape: f32[3], index: 0, kind: input, shape index: {}]   ;;  %s845_s1 = inlined_call_operand.<no memory space> [shape: f32[1], index: 1, kind: input, shape index: {}]   ;;  %s846_s2 = inlined_call_operand.<no memory space> [shape: f32[1], index: 2, kind: input, shape index: {}]   ;;  %s847_s3 = inlined_call_operand.hbm [shape: bf16[512,128], index: 3, kind: input, shape index: {}]   ;;  %s848_s4 = inlined_call_operand.hbm [shape: bf16[8,640], index: 4, kind: input, shape index: {}]   ;;  %s849_s5 = inlined_call_operand.hbm [shape: bf16[8,128], index: 5, kind: output, shape index: {}]  }
   0x1   :  { %13 = vsyncpa [#allocation5], 0 }
   0x2   :  { %14 = vsyncpa [#allocation10], 0 }
   0x3   :  { %15 = vsyncpa [#allocation6], 0  ;;  %s22_s20 = sshll.u32 %s844_s0, 4  ;;  %s23_s20 = int_to_ptr.vmem [resolvable:$true] %s22_s20 }
   0x4   :  { %s647_s21 = scalar_lea.vmem %s23_s20, 16  ;;  %p652_p1 = scmp.lt.s32.totalorder %s23_s20, %s23_s20 }
   0x5   :  { %p648_p0 = scmp.ne.s32.totalorder %s23_s20, %s647_s21  ;;  %p653_p2 = scmp.lt.s32.totalorder %s647_s21, %s647_s21 }
   0x7   :  { %p654_p3 = por %p653_p2, %p652_p1 }
   0x9   :  { %p655_p4 = pnand %p654_p3, %p648_p0 }
   0xb   :  { %658 = shalt.err (!%p655_p4)
}
   0xc   :  { %s733_s22 = smov [#allocation4]   ;;  %s734_s23 = smov [#allocation8]  }
   0xd   :  { %25 = dma.vmem_to_smem %s23_s20, 16, %s733_s22, [#allocation7]  }
   0xe   :  { %s35_s24 = sshll.u32 %s734_s23, 4  ;;  %s659_s27 = scalar_lea.hbm %s847_s3, 4096  ;;  %s36_s24 = int_to_ptr.vmem [resolvable:$true] %s35_s24 }
   0xf   :  { %p660_p5 = scmp.ne.s32.totalorder %s847_s3, %s659_s27  ;;  %p663_p6 = scmp.lt.u32.totalorder %s659_s27, %s847_s3 }
  0x11   :  { %p665_p7 = pnand %p663_p6, %p660_p5 }
  0x13   :  { %668 = shalt.err (!%p665_p7)
}
  0x14   :  { %s669_s6 = scalar_lea.vmem %s36_s24, 4096  ;;  %p674_p9 = scmp.lt.s32.totalorder %s36_s24, %s36_s24 }
  0x15   :  { %p670_p8 = scmp.ne.s32.totalorder %s36_s24, %s669_s6  ;;  %p675_p10 = scmp.lt.s32.totalorder %s669_s6, %s669_s6 }
  0x17   :  { %p676_p11 = por %p675_p10, %p674_p9 }
  0x19   :  { %p677_p12 = pnand %p676_p11, %p670_p8 }
  0x1b   :  { %680 = shalt.err (!%p677_p12)
}
  0x1c   :  { %s735_s7 = smov 64   ;;  %s736_s8 = smov 4  }
  0x1d   :  { %41 = dma.hbm_to_vmem [thread:$0]  %s847_s3, 4096, %s36_s24, [#allocation5], %s735_s7, %s735_s7, %s736_s8  }
  0x1e   :  { %s737_s11 = smov [#allocation9]   ;;  %s681_s15 = scalar_lea.hbm %s848_s4, 320 }
  0x1f   :  { %s48_s12 = sshll.u32 %s737_s11, 4  ;;  %p682_p13 = scmp.ne.s32.totalorder %s848_s4, %s681_s15  ;;  %s49_s12 = int_to_ptr.vmem [resolvable:$true] %s48_s12 }
  0x20   :  { %p685_p0 = scmp.lt.u32.totalorder %s681_s15, %s848_s4 }
  0x22   :  { %p687_p1 = pnand %p685_p0, %p682_p13 }
  0x24   :  { %690 = shalt.err (!%p687_p1)
}
  0x25   :  { %s691_s20 = scalar_lea.vmem %s49_s12, 320  ;;  %p696_p3 = scmp.lt.s32.totalorder %s49_s12, %s49_s12 }
  0x26   :  { %p692_p2 = scmp.ne.s32.totalorder %s49_s12, %s691_s20  ;;  %p697_p4 = scmp.lt.s32.totalorder %s691_s20, %s691_s20 }
  0x28   :  { %p698_p5 = por %p697_p4, %p696_p3 }
  0x2a   :  { %p699_p6 = pnand %p698_p5, %p692_p2 }
  0x2c   :  { %702 = shalt.err (!%p699_p6)
}
  0x2d   :  { %51 = dma.hbm_to_vmem [thread:$0]  %s848_s4, 320, %s49_s12, [#allocation10]  }
  0x2e   :  { %725 = dma.done.wait [#allocation7], 16  }
  0x2f   :  { %726 = vsyncadd [#allocation7], 4294967280 }
  0x30   :  { %727 = dma.done.wait [#allocation5], 4096  }
  0x31   :  { %728 = vsyncadd [#allocation5], 4294963200 }
  0x32   :  { %729 = dma.done.wait [#allocation10], 320  }
  0x33   :  { %730 = vsyncadd [#allocation10], 4294966976 }
  0x34   :  { %61 = sfence }
  0x35   :  { %v65_v0 = vld [vmem:[#allocation9] sm:$0xff]  ;;  %s519_s22 = sld [smem:[#allocation4 + $0x1]]  ;;  %v66_v2 = vld [vmem:[#allocation9 + $0x8] sm:$0xff]  ;;  %s520_s23 = sld [smem:[#allocation4 + $0x2]]  ;;  %v67_v7 = vld [vmem:[#allocation9 + $0x10] sm:$0xf]  ;;  %v149_v63 = vstv %s845_s1 }
  0x36   :  { %v605_v1 = vld [vmem:[#allocation8 + $0x40] sm:$0xff]   ;;  %v798_v4 = vunpack.c.h.bf16 %v65_v0  ;;  %v800_v5 = vunpack.c.l.bf16 %v65_v0  ;;  %v607_v6 = vld [vmem:[#allocation8 + $0x48] sm:$0xff]   ;;  %v802_v8 = vunpack.c.l.bf16 %v66_v2  ;;  %v804_v9 = vunpack.c.h.bf16 %v66_v2  ;;  %v611_v16 = vld [vmem:[#allocation8 + $0x50] sm:$0xff]   ;;  %s738_s4 = smov 124   ;;  %s739_s24 = smov 120  }
  0x37   :  { %v606_v3 = vld [vmem:[#allocation8] sm:$0xff]   ;;  %553 = vmatprep.subr.bf16.mxu0 %v605_v1  ;;  %v609_v12 = vld [vmem:[#allocation8 + $0x8] sm:$0xff]   ;;  %v72_v19 = vunpack.c.l.bf16 %v67_v7  ;;  %v613_v22 = vld [vmem:[#allocation8 + $0x10] sm:$0xff]   ;;  %s73_s25 = sld [smem:[#allocation4]]  ;;  %vm101_vm0 = vcmask 1014784   ;;  %vm136_vm1 = vcmask 982016  }
  0x38   :  { %554 = vmatpush3.bf16.msra.mxu0 %v606_v3  ;;  %v608_v10 = vld [vmem:[#allocation8 + $0xc0] sm:$0xff]   ;;  %v612_v20 = vld [vmem:[#allocation8 + $0xc8] sm:$0xff]   ;;  %v615_v24 = vld [vmem:[#allocation8 + $0x58] sm:$0xff]   ;;  %s740_s29 = smov [#allocation11]  }
  0x39   :  { %555 = vmatprep.subr.bf16.mxu0 %v607_v6  ;;  %575 = vmatprep.subr.bf16.mxu1 %v608_v10  ;;  %v610_v15 = vld [vmem:[#allocation8 + $0x80] sm:$0xff]   ;;  %v614_v23 = vld [vmem:[#allocation8 + $0x88] sm:$0xff]   ;;  %v616_v27 = vld [vmem:[#allocation8 + $0xd0] sm:$0xff]   ;;  %s508_s0 = sshll.u32 %s740_s29, 4  ;;  %s509_s0 = int_to_ptr.vmem [resolvable:$true] %s508_s0 }
  0x3a   :  { %576 = vmatpush3.bf16.msra.mxu1 %v610_v15  ;;  %v617_v28 = vld [vmem:[#allocation8 + $0x18] sm:$0xff]   ;;  %v618_v29 = vld [vmem:[#allocation8 + $0x90] sm:$0xff]   ;;  %v619_v30 = vld [vmem:[#allocation8 + $0x60] sm:$0xff]   ;;  %s703_s30 = scalar_lea.vmem %s509_s0, 64  ;;  %p708_p8 = scmp.lt.s32.totalorder %s509_s0, %s509_s0 }
  0x3b   :  { %v80_v11 = vstv %s519_s22  ;;  %v115_v21 = vstv %s520_s23  ;;  %577 = vmatprep.subr.bf16.mxu1 %v612_v20  ;;  %v620_v33 = vld [vmem:[#allocation8 + $0xd8] sm:$0xff]   ;;  %v621_v34 = vld [vmem:[#allocation8 + $0x20] sm:$0xff]   ;;  %v623_v36 = vld [vmem:[#allocation8 + $0x68] sm:$0xff]   ;;  %p704_p7 = scmp.ne.s32.totalorder %s509_s0, %s703_s30  ;;  %p709_p9 = scmp.lt.s32.totalorder %s703_s30, %s703_s30 }
  0x3c   :  { %v82_v13 = vmul.f32 %v80_v11, %v798_v4  ;;  %v81_v14 = vmul.f32 %v80_v11, %v800_v5  ;;  %556 = vmatpush3.bf16.msra.mxu0 %v609_v12  ;;  %v83_v17 = vmul.f32 %v80_v11, %v802_v8  ;;  %v84_v18 = vmul.f32 %v80_v11, %v804_v9  ;;  %v622_v35 = vld [vmem:[#allocation8 + $0x98] sm:$0xff]   ;;  %v624_v39 = vld [vmem:[#allocation8 + $0xe0] sm:$0xff]   ;;  %v625_v40 = vld [vmem:[#allocation8 + $0x28] sm:$0xff]  }
  0x3d   :  { %557 = vmatprep.subr.bf16.mxu0 %v611_v16  ;;  %v85_v25 = vmul.f32 %v80_v11, %v72_v19  ;;  %v117_v26 = vmul.f32 %v115_v21, %v798_v4  ;;  %v118_v31 = vmul.f32 %v115_v21, %v802_v8  ;;  %v116_v32 = vmul.f32 %v115_v21, %v800_v5  ;;  %v626_v41 = vld [vmem:[#allocation8 + $0xa0] sm:$0xff]   ;;  %v627_v42 = vld [vmem:[#allocation8 + $0x70] sm:$0xff]   ;;  %v628_v43 = vld [vmem:[#allocation8 + $0xe8] sm:$0xff]   ;;  %p710_p10 = por %p709_p9, %p708_p8 }
  0x3e   :  { %93 = vrot.lane.b32.xlu0 %v82_v13, %s738_s4  ;;  %91 = vrot.lane.b32.xlu1 %v81_v14, %s738_s4  ;;  %v119_v37 = vmul.f32 %v115_v21, %v804_v9  ;;  %v120_v38 = vmul.f32 %v115_v21, %v72_v19  ;;  %v629_v44 = vld [vmem:[#allocation8 + $0x30] sm:$0xff]   ;;  %v630_v45 = vld [vmem:[#allocation8 + $0xa8] sm:$0xff]   ;;  %v631_v46 = vld [vmem:[#allocation8 + $0x78] sm:$0xff]   ;;  %v74_v56 = vstv %s73_s25 }
  0x3f   :  { %578 = vmatpush3.bf16.msra.mxu1 %v614_v23  ;;  %v632_v47 = vld [vmem:[#allocation8 + $0xf0] sm:$0xff]   ;;  %v633_v48 = vld [vmem:[#allocation8 + $0x38] sm:$0xff]   ;;  %v75_v57 = vmul.f32 %v74_v56, %v800_v5  ;;  %v76_v58 = vmul.f32 %v74_v56, %v798_v4  ;;  %v77_v2 = vmul.f32 %v74_v56, %v802_v8  ;;  %v78_v3 = vmul.f32 %v74_v56, %v804_v9  ;;  %p711_p11 = pnand %p710_p10, %p704_p7 }
  0x40   :  { %558 = vmatpush3.bf16.msra.mxu0 %v613_v22  ;;  %579 = vmatprep.subr.bf16.mxu1 %v616_v27  ;;  %v634_v49 = vld [vmem:[#allocation8 + $0xb0] sm:$0xff]   ;;  %v635_v50 = vld [vmem:[#allocation8 + $0xf8] sm:$0xff]  }
  0x41   :  { %559 = vmatprep.subr.bf16.mxu0 %v615_v24  ;;  %v636_v51 = vld [vmem:[#allocation8 + $0xb8] sm:$0xff]  }
  0x42   :  { %95 = vrot.lane.b32.xlu0 %v83_v17, %s738_s4  ;;  %97 = vrot.lane.b32.xlu1 %v84_v18, %s738_s4 }
  0x43   :  { %580 = vmatpush3.bf16.msra.mxu1 %v618_v29 }
  0x44   :  { %560 = vmatpush3.bf16.msra.mxu0 %v617_v28  ;;  %581 = vmatprep.subr.bf16.mxu1 %v620_v33 }
  0x45   :  { %561 = vmatprep.subr.bf16.mxu0 %v619_v30 }
  0x46   :  { %99 = vrot.lane.b32.xlu0 %v85_v25, %s738_s4  ;;  %128 = vrot.lane.b32.xlu1 %v117_v26, %s739_s24 }
  0x47   :  { %582 = vmatpush3.bf16.msra.mxu1 %v622_v35 }
  0x48   :  { %562 = vmatpush3.bf16.msra.mxu0 %v621_v34  ;;  %583 = vmatprep.subr.bf16.mxu1 %v624_v39 }
  0x49   :  { %563 = vmatprep.subr.bf16.mxu0 %v623_v36  ;;  %v226_v36 = vstv %s846_s2 }
  0x4a   :  { %130 = vrot.lane.b32.xlu0 %v118_v31, %s739_s24  ;;  %126 = vrot.lane.b32.xlu1 %v116_v32, %s739_s24 }
  0x4b   :  { %584 = vmatpush3.bf16.msra.mxu1 %v626_v41 }
  0x4c   :  { %564 = vmatpush3.bf16.msra.mxu0 %v625_v40  ;;  %585 = vmatprep.subr.bf16.mxu1 %v628_v43 }
  0x4d   :  { %565 = vmatprep.subr.bf16.mxu0 %v627_v42 }
  0x4e   :  { %132 = vrot.lane.b32.xlu0 %v119_v37, %s739_s24  ;;  %134 = vrot.lane.b32.xlu1 %v120_v38, %s739_s24 }
  0x4f   :  { %586 = vmatpush3.bf16.msra.mxu1 %v630_v45 }
  0x50   :  { %566 = vmatpush3.bf16.msra.mxu0 %v629_v44  ;;  %587 = vmatprep.subr.bf16.mxu1 %v632_v47 }
  0x51   :  { %567 = vmatprep.subr.bf16.mxu0 %v631_v46 }
  0x53   :  { %588 = vmatpush3.bf16.msra.mxu1 %v634_v49 }
  0x54   :  { %568 = vmatpush3.bf16.msra.mxu0 %v633_v48  ;;  %589 = vmatprep.subr.bf16.mxu1 %v635_v50 }
  0x57   :  { %590 = vmatpush3.bf16.msra.mxu1 %v636_v51 }
  0xb0   :  { %v94_v52 = vpop.permute.xlu0 %93  ;;  %v92_v53 = vpop.permute.xlu1 %91 }
  0xb1   :  { %v102_v61 = vsel %vm101_vm0, %v92_v53, %v94_v52 }
  0xb2   :  { %v110_v0 = vadd.f32 %v102_v61, %v75_v57 }
  0xb4   :  { %v96_v54 = vpop.permute.xlu0 %95  ;;  %v98_v55 = vpop.permute.xlu1 %97 }
  0xb5   :  { %v103_v62 = vsel %vm101_vm0, %v94_v52, %v96_v54  ;;  %v104_v4 = vsel %vm101_vm0, %v96_v54, %v98_v55 }
  0xb6   :  { %v111_v1 = vadd.f32 %v103_v62, %v76_v58  ;;  %v112_v14 = vadd.f32 %v104_v4, %v77_v2 }
  0xb8   :  { %v100_v59 = vpop.permute.xlu0 %99  ;;  %v129_v60 = vpop.permute.xlu1 %128 }
  0xb9   :  { %v105_v7 = vsel %vm101_vm0, %v98_v55, %v100_v59 }
  0xba   :  { %v113_v15 = vadd.f32 %v105_v7, %v78_v3 }
  0xbc   :  { %v131_v5 = vpop.permute.xlu0 %130  ;;  %v127_v6 = vpop.permute.xlu1 %126 }
  0xbd   :  { %v138_v10 = vsel %vm136_vm1, %v129_v60, %v131_v5  ;;  %v137_v11 = vsel %vm136_vm1, %v127_v6, %v129_v60 }
  0xbe   :  { %v146_v12 = vadd.f32 %v138_v10, %v111_v1  ;;  %v145_v13 = vadd.f32 %v137_v11, %v110_v0 }
  0xc0   :  { %v150_v16 = vadd.f32 %v149_v63, %v145_v13  ;;  %v133_v17 = vpop.permute.xlu0 %132  ;;  %v135_v18 = vpop.permute.xlu1 %134  ;;  %v151_v8 = vadd.f32 %v149_v63, %v146_v12 }
  0xc1   :  { %v139_v9 = vsel %vm136_vm1, %v131_v5, %v133_v17  ;;  %v140_v19 = vsel %vm136_vm1, %v133_v17, %v135_v18 }
  0xc2   :  { %637 = vtanh.f32 %v150_v16  ;;  %v147_v20 = vadd.f32 %v139_v9, %v112_v14  ;;  %v148_v21 = vadd.f32 %v140_v19, %v113_v15 }
  0xc3   :  { %639 = vtanh.f32 %v151_v8 }
  0xc4   :  { %v152_v22 = vadd.f32 %v149_v63, %v147_v20  ;;  %v153_v23 = vadd.f32 %v149_v63, %v148_v21 }
  0xc6   :  { %641 = vtanh.f32 %v152_v22 }
  0xc7   :  { %643 = vtanh.f32 %v153_v23 }
  0xcc   :  { %v638_v24 = vpop.eup %637 }
  0xcd   :  { %v640_v25 = vpop.eup %639  ;;  %v158_v26 = vpack.c.bf16 %v638_v24, %v638_v24 }
  0xce   :  { %v159_v27 = vpack.c.bf16 %v640_v25, %v640_v25 }
  0xd0   :  { %v642_v28 = vpop.eup %641  ;;  %451 = vmatprep.mubr.bf16.mxu0 %v159_v27 }
  0xd1   :  { %v644_v29 = vpop.eup %643  ;;  %452 = vmatmul.mubr.bf16.vlgmr.msra.gmra.mrb[0].mxu0 %v158_v26  ;;  %v160_v30 = vpack.c.bf16 %v642_v28, %v642_v28 }
  0xd2   :  { %v161_v31 = vpack.c.bf16 %v644_v29, %v644_v29 }
  0xd4   :  { %491 = vmatprep.mubr.bf16.mxu1 %v161_v31 }
  0xd5   :  { %492 = vmatmul.mubr.bf16.vlgmr.msra.gmra.mrb[0].mxu1 %v160_v30 }
 0x1a4   :  { %v569_v32 = vpop.f32.mrb[0].mxu0 }
 0x1a5   :  { %v570_v33 = vpop.f32.mrb[1].mxu0 }
 0x1a6   :  { %v571_v34 = vadd.f32 %v570_v33, %v569_v32  ;;  %v572_v35 = vpop.f32.mrb[2].mxu0 }
 0x1a7   :  { %v573_v37 = vpop.f32.mrb[3].mxu0 }
 0x1a8   :  { %v591_v38 = vpop.f32.mrb[0].mxu1  ;;  %v454_v40 = vadd.f32 %v571_v34, %v226_v36 }
 0x1a9   :  { %v592_v39 = vpop.f32.mrb[1].mxu1 }
 0x1aa   :  { %v593_v41 = vadd.f32 %v592_v39, %v591_v38  ;;  %v594_v42 = vpop.f32.mrb[2].mxu1 }
 0x1ab   :  { %v595_v43 = vpop.f32.mrb[3].mxu1 }
 0x1ac   :  { %v494_v44 = vadd.f32 %v593_v41, %v454_v40 }
 0x1ae   :  { %645 = vtanh.f32 %v494_v44 }
 0x1b8   :  { %v646_v45 = vpop.eup %645 }
 0x1b9   :  { %v500_v46 = vpack.c.bf16 %v646_v45, %v646_v45 }
 0x1bb   :  { %501 = vst [vmem:[#allocation11] sm:$0xf] %v500_v46 }
 0x1bc   :  { %714 = shalt.err (!%p711_p11)
}
 0x1bd   :  { %s715_s7 = scalar_lea.hbm %s849_s5, 64 }
 0x1be   :  { %p716_p12 = scmp.ne.s32.totalorder %s849_s5, %s715_s7  ;;  %p719_p13 = scmp.lt.u32.totalorder %s715_s7, %s849_s5 }
 0x1c0   :  { %p721_p0 = pnand %p719_p13, %p716_p12 }
 0x1c2   :  { %724 = shalt.err (!%p721_p0)
}
 0x1c3   :  { %511 = dma.vmem_to_hbm [thread:$0]  %s509_s0, 64, %s849_s5, [#allocation6]  }
 0x1c4   :  { %731 = dma.done.wait [#allocation6], 64  }
 0x1c5   :  { %732 = vsyncadd [#allocation6], 4294967232 }
 0x1c6   :  { %515 = vsyncpa [#allocation5], 1 }
 0x1c7   :  { %516 = vsyncpa [#allocation10], 1 }
 0x1c8   :  { %517 = vsyncpa [#allocation6], 1 }
 0x1c9   :  { %518 = vsyncpa [#allocation7], 1 }

</bundles_post_ra>
